<compile_context>
chip_gen: v5e
topology: v5e:2x2
jax: 0.10.0
libtpu: 0.0.40
codegen_flags: <defaults>
</compile_context>

<pallas_src>
import functools

import numpy as np
import jax
import jax.numpy as jnp
from jax import lax
from jax.experimental import pallas as pl
from jax.experimental.pallas import tpu as pltpu


def _round_up(n, m):
    return ((n + m - 1) // m) * m


def _cross_feature_kernel(x_ref, si_ref, sj_ref, vvp_ref, o_ref):
    x = x_ref[...]        # (TB, F)  f32
    si = si_ref[...]      # (TP, F)  one-hot rows selecting feature i of each pair
    sj = sj_ref[...]      # (TP, F)  one-hot rows selecting feature j of each pair
    vvp = vvp_ref[...]    # (1, TP)  precomputed <v[i_p], v[j_p]>

    # xi[b, p] = x[b, i_p], xj[b, p] = x[b, j_p]  -- MXU selection matmuls (contract F).
    xi = lax.dot_general(x, si, (((1,), (1,)), ((), ())),
                         preferred_element_type=jnp.float32)   # (TB, TP)
    xj = lax.dot_general(x, sj, (((1,), (1,)), ((), ())),
                         preferred_element_type=jnp.float32)   # (TB, TP)

    # Same op order as the reference: (x_i * x_j) * <v_i, v_j>.
    o_ref[...] = (xi * xj) * vvp


@functools.lru_cache(maxsize=None)
def _pair_data(F):
    """Static pair bookkeeping, cached per feature count F."""
    ii, jj = np.triu_indices(F, k=1)       # row-major upper triangle == PyTorch loop order
    P = int(ii.shape[0])
    TP = min(512, _round_up(P, 128))       # pair-axis tile: multiple of 128 (lane dense)
    P_pad = _round_up(P, TP)
    rows = np.arange(P)
    si = np.zeros((P_pad, F), np.float32)
    sj = np.zeros((P_pad, F), np.float32)
    si[rows, ii] = 1.0
    sj[rows, jj] = 1.0
    return (jnp.asarray(si), jnp.asarray(sj),
            jnp.asarray(ii, jnp.int32), jnp.asarray(jj, jnp.int32),
            P, P_pad, TP)


def cross_feature(x, v):
    """x: (B, F) float32; v: (E, C) float32 with F <= E. Returns (B, F*(F-1)//2) float32."""
    x = jnp.asarray(x, jnp.float32)
    B, F = x.shape
    if F < 2:                                   # zero pairs -> empty output
        return jnp.zeros((B, 0), jnp.float32)

    si, sj, idx_i, idx_j, P, P_pad, TP = _pair_data(F)

    # Batch-independent pair dot-products, computed once outside the kernel (f32 exact).
    vF = jnp.asarray(v, jnp.float32)[:F]                        # (F, C)
    vvp = jnp.sum(vF[idx_i] * vF[idx_j], axis=-1)               # (P,)
    vvp = jnp.pad(vvp, (0, P_pad - P)).reshape(1, P_pad)        # (1, P_pad)

    # Batch tiling: sublane-aligned tile, zero-padded rows sliced off below.
    TB = min(256, _round_up(B, 8))
    B_pad = _round_up(B, TB)
    x_pad = jnp.pad(x, ((0, B_pad - B), (0, 0))) if B_pad != B else x

    # Pair axis OUTER, batch axis INNER: the (TP, F) selector blocks keep the same block
    # index across the inner loop and are not re-fetched; only x / out tiles move.
    grid = (P_pad // TP, B_pad // TB)

    # VMEM budget: double-buffered blocks + headroom; fits v5e/v6e (128 MiB) and v7x (64 MiB).
    step_bytes = 4 * (TB * F + 2 * TP * F + TP + TB * TP)
    vmem_limit = int(min(max(4 * step_bytes, 16 << 20), 48 << 20))

    cost = pl.CostEstimate(
        flops=4 * B_pad * F * P_pad + 2 * B_pad * P_pad,
        transcendentals=0,
        bytes_accessed=4 * (B_pad * F + 2 * P_pad * F + P_pad + B_pad * P_pad),
    )

    out = pl.pallas_call(
        _cross_feature_kernel,
        out_shape=jax.ShapeDtypeStruct((B_pad, P_pad), jnp.float32),
        grid_spec=pl.GridSpec(
            grid=grid,
            in_specs=[
                pl.BlockSpec((TB, F), lambda jp, ib: (ib, 0)),   # x tile (batch)
                pl.BlockSpec((TP, F), lambda jp, ib: (jp, 0)),   # si tile (pairs, stays put)
                pl.BlockSpec((TP, F), lambda jp, ib: (jp, 0)),   # sj tile (pairs, stays put)
                pl.BlockSpec((1, TP), lambda jp, ib: (0, jp)),   # pair dot-products
            ],
            out_specs=pl.BlockSpec((TB, TP), lambda jp, ib: (ib, jp)),
        ),
        compiler_params=pltpu.CompilerParams(
            dimension_semantics=("parallel", "parallel"),
            vmem_limit_bytes=vmem_limit,
        ),
        cost_estimate=cost,
    )(x_pad, si, sj, vvp)

    return out[:B, :P]


def _reference(x, v):
    xn = np.asarray(x)
    vn = np.asarray(v)
    B, F = xn.shape
    cols = []
    for i in range(F - 1):
        for j in range(i + 1, F):
            cols.append(xn[:, i] * xn[:, j] * float(np.dot(vn[i], vn[j])))
    if not cols:
        return np.zeros((B, 0), np.float32)
    return np.stack(cols, axis=0).T      # (B, P) == batch_c.T


if __name__ == "__main__":
    key = jax.random.PRNGKey(0)
    kv, kx1, kx2 = jax.random.split(key, 3)

    # Module __init__: C = 4, E = 300, v = torch.rand(E, C)  (uniform [0, 1)).
    E, C = 300, 4
    v = jax.random.uniform(kv, (E, C), dtype=jnp.float32)

    # Small forward-consistent input: (batch, num_features).
    B, F = 2, 8
    x = jax.random.uniform(kx1, (B, F), dtype=jnp.float32)
    out = jax.block_until_ready(cross_feature(x, v))
    np.testing.assert_allclose(np.asarray(out), _reference(x, v), rtol=1e-5, atol=1e-5)

    # Second shape exercising the multi-tile pair-axis grid + padding slice-off.
    B2, F2 = 20, 40
    x2 = jax.random.uniform(kx2, (B2, F2), dtype=jnp.float32)
    out2 = jax.block_until_ready(cross_feature(x2, v))
    np.testing.assert_allclose(np.asarray(out2), _reference(x2, v), rtol=1e-5, atol=1e-5)

    print("KERNEL_OK")
</pallas_src>

<mosaic_0001>
module attributes {stable_mosaic.version = 11 : i64} {
  func.func @_cross_feature_kernel(%arg0: i32, %arg1: i32, %arg2: memref<8x8xf32, #tpu.memory_space<vmem>>, %arg3: memref<128x8xf32, #tpu.memory_space<vmem>>, %arg4: memref<128x8xf32, #tpu.memory_space<vmem>>, %arg5: memref<1x128xf32, #tpu.memory_space<vmem>>, %arg6: memref<8x128xf32, #tpu.memory_space<vmem>>) attributes {dimension_semantics = [#tpu.dimension_semantics<parallel>, #tpu.dimension_semantics<parallel>], iteration_bounds = array<i64: 1, 1>, scalar_prefetch = 0 : i64, scratch_operands = 0 : i64, tpu.core_type = #tpu.core_type<tc>, window_params = [{transform_indices = @transform_0, window_bounds = array<i64: 8, 8>}, {transform_indices = @transform_1, window_bounds = array<i64: 128, 8>}, {transform_indices = @transform_2, window_bounds = array<i64: 128, 8>}, {transform_indices = @transform_3, window_bounds = array<i64: 1, 128>}, {transform_indices = @transform_4, window_bounds = array<i64: 8, 128>}]} {
    %c0 = arith.constant 0 : index
    %c0_0 = arith.constant 0 : index
    %0 = vector.load %arg2[%c0, %c0_0] : memref<8x8xf32, #tpu.memory_space<vmem>>, vector<8x8xf32>
    %c0_1 = arith.constant 0 : index
    %c0_2 = arith.constant 0 : index
    %1 = vector.load %arg3[%c0_1, %c0_2] : memref<128x8xf32, #tpu.memory_space<vmem>>, vector<128x8xf32>
    %c0_3 = arith.constant 0 : index
    %c0_4 = arith.constant 0 : index
    %2 = vector.load %arg4[%c0_3, %c0_4] : memref<128x8xf32, #tpu.memory_space<vmem>>, vector<128x8xf32>
    %c0_5 = arith.constant 0 : index
    %c0_6 = arith.constant 0 : index
    %3 = vector.load %arg5[%c0_5, %c0_6] : memref<1x128xf32, #tpu.memory_space<vmem>>, vector<1x128xf32>
    %cst = arith.constant dense<0.000000e+00> : vector<8x128xf32>
    %4 = tpu.matmul %0, %1, %cst {dimension_numbers = #tpu.dot_dimension_numbers<[1], [1], [0], [0], [0, 0, 1, 0], [], []>} : vector<8x8xf32>, vector<128x8xf32>, vector<8x128xf32> -> vector<8x128xf32>
    %cst_7 = arith.constant dense<0.000000e+00> : vector<8x128xf32>
    %5 = tpu.matmul %0, %2, %cst_7 {dimension_numbers = #tpu.dot_dimension_numbers<[1], [1], [0], [0], [0, 0, 1, 0], [], []>} : vector<8x8xf32>, vector<128x8xf32>, vector<8x128xf32> -> vector<8x128xf32>
    %6 = arith.mulf %4, %5 : vector<8x128xf32>
    %7 = vector.broadcast %3 : vector<1x128xf32> to vector<8x128xf32>
    %8 = arith.mulf %6, %7 : vector<8x128xf32>
    %c0_8 = arith.constant 0 : index
    %c0_9 = arith.constant 0 : index
    %9 = vector.load %arg6[%c0_8, %c0_9] : memref<8x128xf32, #tpu.memory_space<vmem>>, vector<8x128xf32>
    tpu.vector_store %arg6[%c0_8, %c0_9], %8 {strides = array<i32>} : memref<8x128xf32, #tpu.memory_space<vmem>>, vector<8x128xf32>,
    return
  }
  func.func @transform_0(%arg0: i32, %arg1: i32) -> (i32, i32) {
    %c0_i32 = arith.constant 0 : i32
    %c0_i32_0 = arith.constant 0 : i32
    return %arg1, %c0_i32 : i32, i32
  }
  func.func @transform_1(%arg0: i32, %arg1: i32) -> (i32, i32) {
    %c0_i32 = arith.constant 0 : i32
    %c0_i32_0 = arith.constant 0 : i32
    return %arg0, %c0_i32 : i32, i32
  }
  func.func @transform_2(%arg0: i32, %arg1: i32) -> (i32, i32) {
    %c0_i32 = arith.constant 0 : i32
    %c0_i32_0 = arith.constant 0 : i32
    return %arg0, %c0_i32 : i32, i32
  }
  func.func @transform_3(%arg0: i32, %arg1: i32) -> (i32, i32) {
    %c0_i32 = arith.constant 0 : i32
    %c0_i32_0 = arith.constant 0 : i32
    return %c0_i32, %arg0 : i32, i32
  }
  func.func @transform_4(%arg0: i32, %arg1: i32) -> (i32, i32) {
    %c0_i32 = arith.constant 0 : i32
    return %arg1, %arg0 : i32, i32
  }
}

</mosaic_0001>

<bundles_post_ra>
// kernel: tpu_custom_call.1
= control target key start
LH: loop header
LB: loop body
LE: loop exit
PB: predicated region body
PF: predicated region fallthrough
CT: control target
= control target key end

     0   :  { %vm52_vm0 = vcmask 64512   ;;  %s441_s0 = inlined_call_operand.vmem [shape: f32[8,8], index: 0, kind: input, shape index: {}]   ;;  %s442_s1 = inlined_call_operand.vmem [shape: f32[128,8], index: 1, kind: input, shape index: {}]   ;;  %s443_s2 = inlined_call_operand.vmem [shape: f32[128,8], index: 2, kind: input, shape index: {}]   ;;  %s444_s3 = inlined_call_operand.vmem [shape: f32[1,128], index: 3, kind: input, shape index: {}]   ;;  %s445_s4 = inlined_call_operand.hbm [shape: f32[8,128], index: 4, kind: output, shape index: {}]  }
   0x1   :  { %v34_v0 = vld [vmem:[%s442_s1 + $0x78] sm:$0xff]  ;;  %v33_v2 = vld [vmem:[%s442_s1 + $0x70] sm:$0xff]  ;;  %v32_v4 = vld [vmem:[%s442_s1 + $0x68] sm:$0xff] }
   0x2   :  { %v50_v1 = vld [vmem:[%s443_s2 + $0x78] sm:$0xff]  ;;  %214 = vmatpush.xpose.msk.msra.mxu0 %vm52_vm0, %v34_v0  ;;  %v49_v3 = vld [vmem:[%s443_s2 + $0x70] sm:$0xff]  ;;  %v48_v5 = vld [vmem:[%s443_s2 + $0x68] sm:$0xff] }
   0x3   :  { %231 = vmatpush.xpose.msk.msra.mxu1 %vm52_vm0, %v50_v1 }
   0x6   :  { %215 = vmatpush.xpose.msk.msra.mxu0 %vm52_vm0, %v33_v2 }
   0x7   :  { %232 = vmatpush.xpose.msk.msra.mxu1 %vm52_vm0, %v49_v3 }
   0x8   :  { %9 = vsyncpa [#allocation3], 0  ;;  %v31_v6 = vld [vmem:[%s442_s1 + $0x60] sm:$0xff]  ;;  %v30_v8 = vld [vmem:[%s442_s1 + $0x58] sm:$0xff]  ;;  %s205_s7 = sshll.u32 %s445_s4, 4  ;;  %s206_s7 = int_to_ptr.hbm [resolvable:$true] %s205_s7 }
   0x9   :  { %v47_v7 = vld [vmem:[%s443_s2 + $0x60] sm:$0xff]  ;;  %v46_v9 = vld [vmem:[%s443_s2 + $0x58] sm:$0xff]  ;;  %v29_v10 = vld [vmem:[%s442_s1 + $0x50] sm:$0xff] }
   0xa   :  { %216 = vmatpush.xpose.msk.msra.mxu0 %vm52_vm0, %v32_v4  ;;  %v45_v11 = vld [vmem:[%s443_s2 + $0x50] sm:$0xff]  ;;  %v28_v12 = vld [vmem:[%s442_s1 + $0x48] sm:$0xff]  ;;  %v27_v14 = vld [vmem:[%s442_s1 + $0x40] sm:$0xff] }
   0xb   :  { %233 = vmatpush.xpose.msk.msra.mxu1 %vm52_vm0, %v48_v5  ;;  %v44_v13 = vld [vmem:[%s443_s2 + $0x48] sm:$0xff]  ;;  %v43_v15 = vld [vmem:[%s443_s2 + $0x40] sm:$0xff]  ;;  %v26_v16 = vld [vmem:[%s442_s1 + $0x38] sm:$0xff] }
   0xc   :  { %v42_v17 = vld [vmem:[%s443_s2 + $0x38] sm:$0xff]  ;;  %v25_v18 = vld [vmem:[%s442_s1 + $0x30] sm:$0xff]  ;;  %v24_v20 = vld [vmem:[%s442_s1 + $0x28] sm:$0xff] }
   0xd   :  { %v41_v19 = vld [vmem:[%s443_s2 + $0x30] sm:$0xff]  ;;  %v40_v21 = vld [vmem:[%s443_s2 + $0x28] sm:$0xff]  ;;  %v23_v22 = vld [vmem:[%s442_s1 + $0x20] sm:$0xff] }
   0xe   :  { %217 = vmatpush.xpose.msk.msra.mxu0 %vm52_vm0, %v31_v6  ;;  %v39_v23 = vld [vmem:[%s443_s2 + $0x20] sm:$0xff]  ;;  %v22_v24 = vld [vmem:[%s442_s1 + $0x18] sm:$0xff]  ;;  %v21_v26 = vld [vmem:[%s442_s1 + $0x10] sm:$0xff] }
   0xf   :  { %234 = vmatpush.xpose.msk.msra.mxu1 %vm52_vm0, %v47_v7  ;;  %v38_v25 = vld [vmem:[%s443_s2 + $0x18] sm:$0xff]  ;;  %v37_v27 = vld [vmem:[%s443_s2 + $0x10] sm:$0xff]  ;;  %v20_v28 = vld [vmem:[%s442_s1 + $0x8] sm:$0xff] }
  0x10   :  { %v36_v29 = vld [vmem:[%s443_s2 + $0x8] sm:$0xff]  ;;  %v19_v30 = vld [vmem:[%s442_s1] sm:$0xff]  ;;  %s276_s1 = smov [#allocation2]  }
  0x11   :  { %v35_v31 = vld [vmem:[%s443_s2] sm:$0xff]  ;;  %s203_s2 = sshll.u32 %s276_s1, 4  ;;  %s204_s2 = int_to_ptr.vmem [resolvable:$true] %s203_s2 }
  0x12   :  { %218 = vmatpush.xpose.msk.msra.mxu0 %vm52_vm0, %v30_v8  ;;  %v18_v32 = vld [vmem:[%s441_s0] sm:$0xff] }
  0x13   :  { %235 = vmatpush.xpose.msk.msra.mxu1 %vm52_vm0, %v46_v9  ;;  %v249_v33 = vld [vmem:[%s444_s3] ss:$0 sm:$0xff] }
  0x16   :  { %219 = vmatpush.xpose.msk.msra.mxu0 %vm52_vm0, %v29_v10 }
  0x17   :  { %236 = vmatpush.xpose.msk.msra.mxu1 %vm52_vm0, %v45_v11 }
  0x1a   :  { %220 = vmatpush.xpose.msk.msra.mxu0 %vm52_vm0, %v28_v12 }
  0x1b   :  { %237 = vmatpush.xpose.msk.msra.mxu1 %vm52_vm0, %v44_v13 }
  0x1e   :  { %221 = vmatpush.xpose.msk.msra.mxu0 %vm52_vm0, %v27_v14 }
  0x1f   :  { %238 = vmatpush.xpose.msk.msra.mxu1 %vm52_vm0, %v43_v15 }
  0x22   :  { %222 = vmatpush.xpose.msk.msra.mxu0 %vm52_vm0, %v26_v16 }
  0x23   :  { %239 = vmatpush.xpose.msk.msra.mxu1 %vm52_vm0, %v42_v17 }
  0x26   :  { %223 = vmatpush.xpose.msk.msra.mxu0 %vm52_vm0, %v25_v18 }
  0x27   :  { %240 = vmatpush.xpose.msk.msra.mxu1 %vm52_vm0, %v41_v19 }
  0x2a   :  { %224 = vmatpush.xpose.msk.msra.mxu0 %vm52_vm0, %v24_v20 }
  0x2b   :  { %241 = vmatpush.xpose.msk.msra.mxu1 %vm52_vm0, %v40_v21 }
  0x2e   :  { %225 = vmatpush.xpose.msk.msra.mxu0 %vm52_vm0, %v23_v22 }
  0x2f   :  { %242 = vmatpush.xpose.msk.msra.mxu1 %vm52_vm0, %v39_v23 }
  0x32   :  { %226 = vmatpush.xpose.msk.msra.mxu0 %vm52_vm0, %v22_v24 }
  0x33   :  { %243 = vmatpush.xpose.msk.msra.mxu1 %vm52_vm0, %v38_v25 }
  0x36   :  { %227 = vmatpush.xpose.msk.msra.mxu0 %vm52_vm0, %v21_v26 }
  0x37   :  { %244 = vmatpush.xpose.msk.msra.mxu1 %vm52_vm0, %v37_v27 }
  0x3a   :  { %228 = vmatpush.xpose.msk.msra.mxu0 %vm52_vm0, %v20_v28 }
  0x3b   :  { %245 = vmatpush.xpose.msk.msra.mxu1 %vm52_vm0, %v36_v29 }
  0x3e   :  { %229 = vmatpush.xpose.msk.msra.mxu0 %vm52_vm0, %v19_v30 }
  0x3f   :  { %246 = vmatpush.xpose.msk.msra.mxu1 %vm52_vm0, %v35_v31 }
  0x41   :  { %230 = vmatmul.msk.f32.vlgmr.msra.gmra.mxu0 %vm52_vm0, %v18_v32 }
  0x42   :  { %247 = vmatmul.msk.f32.vlgmr.msra.gmra.mxu1 %vm52_vm0, %v18_v32 }
  0xbe   :  { %v121_v34 = vpop.f32.mrf.mxu0 }
  0xbf   :  { %v189_v35 = vpop.f32.mrf.mxu1 }
  0xc0   :  { %v192_v36 = vmul.f32 %v189_v35, %v121_v34 }
  0xc2   :  { %v196_v37 = vmul.f32 %v249_v33, %v192_v36 }
  0xc4   :  { %197 = vst [vmem:[#allocation2] sm:$0xff] %v196_v37 }
  0xc5   :  { %208 = dma.vmem_to_hbm [thread:$0]  %s204_s2, 128, %s206_s7, [#allocation3]  }
  0xc6   :  { %274 = dma.done.wait [#allocation3], 128  }
  0xc7   :  { %275 = vsyncadd [#allocation3], 4294967168 }
  0xc8   :  { %213 = vsyncpa [#allocation3], 1 }

</bundles_post_ra>
